<compile_context>
chip_gen: v5e
topology: v5e:2x2
jax: 0.10.0
libtpu: 0.0.40
codegen_flags: <defaults>
</compile_context>

<pallas_src>
import functools

import jax
import jax.numpy as jnp
from jax.experimental import pallas as pl
from jax.experimental.pallas import tpu as pltpu


# ---------------------------------------------------------------------------
# Pass 1: packed QKV projection, head split fused into the stores.
# grid = (batch, n_seq_tiles)
# ---------------------------------------------------------------------------
def _qkv_proj_kernel(x_ref, w_ref, q_ref, k_ref, v_ref, *, heads, dim_head):
    inner = heads * dim_head
    x = x_ref[0]                                                 # (ts, dim)
    # One MXU weight stream for q, k and v; f32 accumulation.
    y = jnp.dot(x, w_ref[...], preferred_element_type=jnp.float32)  # (ts, 3*inner)
    # Per-head lane slices stored straight into (1, heads, ts, dim_head)
    # blocks: the 'b n (h d) -> b h n d' rearrange happens here for free in an
    # HBM-bound pass instead of as an extra XLA transpose round-trip.
    for h in range(heads):
        lo = h * dim_head
        q_ref[0, h] = y[:, lo:lo + dim_head].astype(q_ref.dtype)
        k_ref[0, h] = y[:, inner + lo:inner + lo + dim_head].astype(k_ref.dtype)
        v_ref[0, h] = y[:, 2 * inner + lo:2 * inner + lo + dim_head].astype(v_ref.dtype)


# ---------------------------------------------------------------------------
# Pass 2: flash attention (online softmax) + fused output projection.
# grid = (batch, n_q_tiles, n_kv_tiles); kv axis is the reduction axis.
# ---------------------------------------------------------------------------
def _flash_attn_kernel(q_ref, k_ref, v_ref, wout_ref, bout_ref, o_ref,
                       m_scr, l_scr, acc_scr, ocat_scr, *, heads, dim_head):
    ki = pl.program_id(2)

    @pl.when(ki == 0)
    def _():
        m_scr[...] = jnp.full(m_scr.shape, -jnp.inf, dtype=m_scr.dtype)
        l_scr[...] = jnp.zeros(l_scr.shape, dtype=l_scr.dtype)
        acc_scr[...] = jnp.zeros(acc_scr.shape, dtype=acc_scr.dtype)

    q = q_ref[0]                                     # (H, tq, d), pre-scaled
    k = k_ref[0]                                     # (H, tk, d)
    v = v_ref[0]                                     # (H, tk, d)

    # Batched per-head scores on the MXU (leading batch dim, no k.T).
    s = jnp.einsum('hqd,hkd->hqk', q, k,
                   preferred_element_type=jnp.float32)           # (H,tq,tk) f32

    m_prev = m_scr[...]                                          # (H, tq, 1)
    m_new = jnp.maximum(m_prev, jnp.max(s, axis=-1, keepdims=True))
    alpha = jnp.exp(m_prev - m_new)                              # f32
    # exp in the activation dtype: bf16 inputs -> bf16 EUP on v6e/v7x (p feeds
    # a bf16 matmul anyway); f32 inputs (v5e / demo) stay f32.
    p = jnp.exp((s - m_new).astype(v.dtype))                     # (H, tq, tk)

    l_scr[...] = alpha * l_scr[...] + jnp.sum(
        p, axis=-1, keepdims=True, dtype=jnp.float32)
    acc_scr[...] = alpha * acc_scr[...] + jnp.einsum(
        'hqk,hkd->hqd', p, v, preferred_element_type=jnp.float32)  # (H,tq,d)
    m_scr[...] = m_new

    @pl.when(ki == pl.num_programs(2) - 1)
    def _():
        inv_l = pl.reciprocal(l_scr[...], approx=False)          # (H, tq, 1)
        out = acc_scr[...] * inv_l                               # (H, tq, d) f32
        # Head merge 'h q d -> q (h d)' via lane-offset stores into VMEM
        # scratch (no reshape/relayout op), then a SINGLE
        # (tq, inner) x (inner, dim) MXU matmul for the output projection.
        for h in range(heads):
            lo = h * dim_head
            ocat_scr[:, lo:lo + dim_head] = out[h].astype(ocat_scr.dtype)
        y = jnp.dot(ocat_scr[...], wout_ref[...],
                    preferred_element_type=jnp.float32)          # (tq, dim)
        y = y + bout_ref[...].astype(jnp.float32)                # (1, dim) bcast
        o_ref[0] = y.astype(o_ref.dtype)


# ---------------------------------------------------------------------------
# Host-side helpers.
# ---------------------------------------------------------------------------
def _pick_seq_tile(n, target, granule):
    """Largest multiple-of-`granule` divisor of n that is <= target; else n."""
    if n <= target:
        return n
    t = (target // granule) * granule
    while t >= granule:
        if n % t == 0:
            return t
        t -= granule
    # TODO(synk): pad ragged sequence lengths instead of using one full tile.
    return n


def _vmem_budget():
    """(vmem_limit_bytes, vmem_capacity_bytes) for the local TPU generation."""
    cap = 64 * 1024 * 1024
    try:
        cap = int(pltpu.get_tpu_info().vmem_capacity_bytes)
    except Exception:
        pass
    # Leave ~8 MiB compiler headroom; never ask for more than 100 MiB even on
    # 128 MiB parts (v5e/v6e); v7x (64 MiB) ends up at ~56 MiB.
    limit = min(max(cap - 8 * 1024 * 1024, 32 * 1024 * 1024), 100 * 1024 * 1024)
    return int(limit), int(cap)


def attention_forward(x, w_qkv, w_out, b_out, *, heads, dim_head,
                      q_tile=512, kv_tile=256):
    """x: (B, N, dim); w_qkv: (dim, 3*heads*dim_head); w_out: (inner, dim)."""
    b, n, dim = x.shape
    inner = heads * dim_head
    assert w_qkv.shape == (dim, 3 * inner)
    assert w_out.shape == (inner, dim)
    scale = float(dim_head) ** -0.5

    vmem_limit, vmem_cap = _vmem_budget()
    if vmem_cap <= 64 * 1024 * 1024:          # v7x-class VMEM: keep kv tiles small
        kv_tile = min(kv_tile, 128)

    granule = 16 if x.dtype == jnp.bfloat16 else 8

    # Fold the softmax scale into the q columns of the packed weight.
    w_packed = jnp.concatenate([w_qkv[:, :inner] * scale, w_qkv[:, inner:]],
                               axis=-1)
    w_packed = w_packed.astype(x.dtype)
    w_out = w_out.astype(x.dtype)

    # ------------------- pass 1: packed QKV projection -------------------
    ts = _pick_seq_tile(n, 512, granule)
    qkv_shape = jax.ShapeDtypeStruct((b, heads, n, dim_head), x.dtype)
    proj_kernel = functools.partial(_qkv_proj_kernel, heads=heads,
                                    dim_head=dim_head)
    q, k, v = pl.pallas_call(
        proj_kernel,
        out_shape=(qkv_shape, qkv_shape, qkv_shape),
        grid_spec=pltpu.PrefetchScalarGridSpec(
            num_scalar_prefetch=0,
            grid=(b, n // ts),
            in_specs=[
                pl.BlockSpec((1, ts, dim), lambda bi, si: (bi, si, 0)),
                pl.BlockSpec((dim, 3 * inner), lambda bi, si: (0, 0)),
            ],
            out_specs=[
                pl.BlockSpec((1, heads, ts, dim_head),
                             lambda bi, si: (bi, 0, si, 0)),
                pl.BlockSpec((1, heads, ts, dim_head),
                             lambda bi, si: (bi, 0, si, 0)),
                pl.BlockSpec((1, heads, ts, dim_head),
                             lambda bi, si: (bi, 0, si, 0)),
            ]),
        compiler_params=pltpu.CompilerParams(
            dimension_semantics=("parallel", "parallel"),
            vmem_limit_bytes=vmem_limit),
    )(x, w_packed)

    # -------- pass 2: flash attention + fused output projection ----------
    tq = _pick_seq_tile(n, q_tile, granule)
    # Keep >= 2 grid tiles for 2-TC parts when the batch alone doesn't split.
    if b * (n // tq) < 2:
        half = _pick_seq_tile(n, max(granule, tq // 2), granule)
        if half < tq:
            tq = half
    tk = _pick_seq_tile(n, kv_tile, granule)

    attn_kernel = functools.partial(_flash_attn_kernel, heads=heads,
                                    dim_head=dim_head)
    out = pl.pallas_call(
        attn_kernel,
        out_shape=jax.ShapeDtypeStruct((b, n, dim), x.dtype),
        grid_spec=pltpu.PrefetchScalarGridSpec(
            num_scalar_prefetch=0,
            grid=(b, n // tq, n // tk),
            in_specs=[
                pl.BlockSpec((1, heads, tq, dim_head),
                             lambda bi, qi, ki: (bi, 0, qi, 0)),
                pl.BlockSpec((1, heads, tk, dim_head),
                             lambda bi, qi, ki: (bi, 0, ki, 0)),
                pl.BlockSpec((1, heads, tk, dim_head),
                             lambda bi, qi, ki: (bi, 0, ki, 0)),
                pl.BlockSpec((inner, dim), lambda bi, qi, ki: (0, 0)),
                pl.BlockSpec((1, dim), lambda bi, qi, ki: (0, 0)),
            ],
            out_specs=pl.BlockSpec((1, tq, dim),
                                   lambda bi, qi, ki: (bi, qi, 0)),
            scratch_shapes=[
                pltpu.VMEM((heads, tq, 1), jnp.float32),         # m
                pltpu.VMEM((heads, tq, 1), jnp.float32),         # l
                pltpu.VMEM((heads, tq, dim_head), jnp.float32),  # acc
                pltpu.VMEM((tq, inner), x.dtype),                # head-merged out
            ]),
        compiler_params=pltpu.CompilerParams(
            dimension_semantics=("parallel", "parallel", "arbitrary"),
            vmem_limit_bytes=vmem_limit),
    )(q, k, v, w_out, b_out.astype(x.dtype).reshape(1, dim))

    return out


def attention_reference(x, w_qkv, w_out, b_out, *, heads, dim_head):
    """Pure-JAX reference mirroring the PyTorch forward (eval mode)."""
    b, n, dim = x.shape
    inner = heads * dim_head
    scale = float(dim_head) ** -0.5
    qkv = jnp.einsum('bnd,df->bnf', x, w_qkv)
    q, k, v = jnp.split(qkv, 3, axis=-1)

    def split_heads(t):  # 'b n (h d) -> b h n d'
        return t.reshape(b, n, heads, dim_head).transpose(0, 2, 1, 3)

    q, k, v = map(split_heads, (q, k, v))
    dots = jnp.einsum('bhnd,bhmd->bhnm', q, k) * scale
    attn = jax.nn.softmax(dots, axis=-1)
    out = jnp.einsum('bhnm,bhmd->bhnd', attn, v)
    out = out.transpose(0, 2, 1, 3).reshape(b, n, inner)  # 'b h n d -> b n (h d)'
    return jnp.einsum('bni,id->bnd', out, w_out) + b_out


if __name__ == "__main__":
    # Small shapes consistent with the module's forward: x is (batch, seq, dim).
    B, N, DIM = 2, 8, 32
    HEADS, DIM_HEAD = 4, 16
    INNER = HEADS * DIM_HEAD   # project_out = True for this config

    key = jax.random.PRNGKey(0)
    kx, kq, ko, kb = jax.random.split(key, 4)

    x = jax.random.normal(kx, (B, N, DIM), dtype=jnp.float32)
    # Linear weights stored pre-transposed (kernel computes x @ W).
    w_qkv = jax.random.normal(kq, (DIM, 3 * INNER), dtype=jnp.float32) * (DIM ** -0.5)
    w_out = jax.random.normal(ko, (INNER, DIM), dtype=jnp.float32) * (INNER ** -0.5)
    b_out = jax.random.normal(kb, (DIM,), dtype=jnp.float32) * 0.02

    y_ref = attention_reference(x, w_qkv, w_out, b_out,
                                heads=HEADS, dim_head=DIM_HEAD)

    # --- f32 path (matches the PyTorch default-dtype forward) ---
    y = attention_forward(x, w_qkv, w_out, b_out, heads=HEADS, dim_head=DIM_HEAD)
    y = jax.block_until_ready(y)
    assert y.shape == (B, N, DIM)
    assert jnp.allclose(y, y_ref, atol=1e-3, rtol=1e-3), "f32 mismatch vs reference"

    # --- bf16 path (exercises the bf16 MXU / bf16-exp fast path) ---
    y_bf16 = attention_forward(x.astype(jnp.bfloat16),
                               w_qkv.astype(jnp.bfloat16),
                               w_out.astype(jnp.bfloat16),
                               b_out.astype(jnp.bfloat16),
                               heads=HEADS, dim_head=DIM_HEAD)
    y_bf16 = jax.block_until_ready(y_bf16)
    assert y_bf16.shape == (B, N, DIM)
    assert jnp.allclose(y_bf16.astype(jnp.float32), y_ref,
                        atol=1e-1, rtol=1e-1), "bf16 mismatch vs reference"

    print("KERNEL_OK")
</pallas_src>

<mosaic_0001>
module attributes {stable_mosaic.version = 11 : i64} {
  func.func @_qkv_proj_kernel(%arg0: i32, %arg1: i32, %arg2: memref<1x8x32xf32, #tpu.memory_space<vmem>>, %arg3: memref<32x192xf32, #tpu.memory_space<vmem>>, %arg4: memref<1x4x8x16xf32, #tpu.memory_space<vmem>>, %arg5: memref<1x4x8x16xf32, #tpu.memory_space<vmem>>, %arg6: memref<1x4x8x16xf32, #tpu.memory_space<vmem>>) attributes {dimension_semantics = [#tpu.dimension_semantics<parallel>, #tpu.dimension_semantics<parallel>], iteration_bounds = array<i64: 2, 1>, scalar_prefetch = 0 : i64, scratch_operands = 0 : i64, tpu.core_type = #tpu.core_type<tc>, window_params = [{transform_indices = @transform_0, window_bounds = array<i64: 1, 8, 32>}, {pipeline_mode = #tpu.pipeline_mode<synchronous>, transform_indices = @transform_1, window_bounds = array<i64: 32, 192>}, {transform_indices = @transform_2, window_bounds = array<i64: 1, 4, 8, 16>}, {transform_indices = @transform_3, window_bounds = array<i64: 1, 4, 8, 16>}, {transform_indices = @transform_4, window_bounds = array<i64: 1, 4, 8, 16>}]} {
    %c0 = arith.constant 0 : index
    %c0_0 = arith.constant 0 : index
    %c0_1 = arith.constant 0 : index
    %0 = vector.load %arg2[%c0, %c0_0, %c0_1] : memref<1x8x32xf32, #tpu.memory_space<vmem>>, vector<1x8x32xf32>
    %1 = vector.shape_cast %0 : vector<1x8x32xf32> to vector<8x32xf32>
    %c0_2 = arith.constant 0 : index
    %c0_3 = arith.constant 0 : index
    %2 = vector.load %arg3[%c0_2, %c0_3] : memref<32x192xf32, #tpu.memory_space<vmem>>, vector<32x192xf32>
    %cst = arith.constant dense<0.000000e+00> : vector<8x192xf32>
    %3 = tpu.matmul %1, %2, %cst {dimension_numbers = #tpu.dot_dimension_numbers<[1], [0], [0], [1], [0, 0, 1, 1], [], []>} : vector<8x32xf32>, vector<32x192xf32>, vector<8x192xf32> -> vector<8x192xf32>
    %4 = vector.extract_strided_slice %3 {offsets = [0, 0], sizes = [8, 16], strides = [1, 1]} : vector<8x192xf32> to vector<8x16xf32>
    %c0_4 = arith.constant 0 : index
    %c0_5 = arith.constant 0 : index
    %c0_6 = arith.constant 0 : index
    %c0_7 = arith.constant 0 : index
    %5 = vector.load %arg4[%c0_4, %c0_5, %c0_6, %c0_7] : memref<1x4x8x16xf32, #tpu.memory_space<vmem>>, vector<1x1x8x16xf32>
    %6 = vector.shape_cast %5 : vector<1x1x8x16xf32> to vector<8x16xf32>
    %7 = vector.shape_cast %4 : vector<8x16xf32> to vector<1x1x8x16xf32>
    tpu.vector_store %arg4[%c0_4, %c0_5, %c0_6, %c0_7], %7 {strides = array<i32>} : memref<1x4x8x16xf32, #tpu.memory_space<vmem>>, vector<1x1x8x16xf32>,
    %8 = vector.extract_strided_slice %3 {offsets = [0, 64], sizes = [8, 16], strides = [1, 1]} : vector<8x192xf32> to vector<8x16xf32>
    %c0_8 = arith.constant 0 : index
    %c0_9 = arith.constant 0 : index
    %c0_10 = arith.constant 0 : index
    %c0_11 = arith.constant 0 : index
    %9 = vector.load %arg5[%c0_8, %c0_9, %c0_10, %c0_11] : memref<1x4x8x16xf32, #tpu.memory_space<vmem>>, vector<1x1x8x16xf32>
    %10 = vector.shape_cast %9 : vector<1x1x8x16xf32> to vector<8x16xf32>
    %11 = vector.shape_cast %8 : vector<8x16xf32> to vector<1x1x8x16xf32>
    tpu.vector_store %arg5[%c0_8, %c0_9, %c0_10, %c0_11], %11 {strides = array<i32>} : memref<1x4x8x16xf32, #tpu.memory_space<vmem>>, vector<1x1x8x16xf32>,
    %12 = vector.extract_strided_slice %3 {offsets = [0, 128], sizes = [8, 16], strides = [1, 1]} : vector<8x192xf32> to vector<8x16xf32>
    %c0_12 = arith.constant 0 : index
    %c0_13 = arith.constant 0 : index
    %c0_14 = arith.constant 0 : index
    %c0_15 = arith.constant 0 : index
    %13 = vector.load %arg6[%c0_12, %c0_13, %c0_14, %c0_15] : memref<1x4x8x16xf32, #tpu.memory_space<vmem>>, vector<1x1x8x16xf32>
    %14 = vector.shape_cast %13 : vector<1x1x8x16xf32> to vector<8x16xf32>
    %15 = vector.shape_cast %12 : vector<8x16xf32> to vector<1x1x8x16xf32>
    tpu.vector_store %arg6[%c0_12, %c0_13, %c0_14, %c0_15], %15 {strides = array<i32>} : memref<1x4x8x16xf32, #tpu.memory_space<vmem>>, vector<1x1x8x16xf32>,
    %16 = vector.extract_strided_slice %3 {offsets = [0, 16], sizes = [8, 16], strides = [1, 1]} : vector<8x192xf32> to vector<8x16xf32>
    %c0_16 = arith.constant 0 : index
    %c1 = arith.constant 1 : index
    %c0_17 = arith.constant 0 : index
    %c0_18 = arith.constant 0 : index
    %17 = vector.load %arg4[%c0_16, %c1, %c0_17, %c0_18] : memref<1x4x8x16xf32, #tpu.memory_space<vmem>>, vector<1x1x8x16xf32>
    %18 = vector.shape_cast %17 : vector<1x1x8x16xf32> to vector<8x16xf32>
    %19 = vector.shape_cast %16 : vector<8x16xf32> to vector<1x1x8x16xf32>
    tpu.vector_store %arg4[%c0_16, %c1, %c0_17, %c0_18], %19 {strides = array<i32>} : memref<1x4x8x16xf32, #tpu.memory_space<vmem>>, vector<1x1x8x16xf32>,
    %20 = vector.extract_strided_slice %3 {offsets = [0, 80], sizes = [8, 16], strides = [1, 1]} : vector<8x192xf32> to vector<8x16xf32>
    %c0_19 = arith.constant 0 : index
    %c1_20 = arith.constant 1 : index
    %c0_21 = arith.constant 0 : index
    %c0_22 = arith.constant 0 : index
    %21 = vector.load %arg5[%c0_19, %c1_20, %c0_21, %c0_22] : memref<1x4x8x16xf32, #tpu.memory_space<vmem>>, vector<1x1x8x16xf32>
    %22 = vector.shape_cast %21 : vector<1x1x8x16xf32> to vector<8x16xf32>
    %23 = vector.shape_cast %20 : vector<8x16xf32> to vector<1x1x8x16xf32>
    tpu.vector_store %arg5[%c0_19, %c1_20, %c0_21, %c0_22], %23 {strides = array<i32>} : memref<1x4x8x16xf32, #tpu.memory_space<vmem>>, vector<1x1x8x16xf32>,
    %24 = vector.extract_strided_slice %3 {offsets = [0, 144], sizes = [8, 16], strides = [1, 1]} : vector<8x192xf32> to vector<8x16xf32>
    %c0_23 = arith.constant 0 : index
    %c1_24 = arith.constant 1 : index
    %c0_25 = arith.constant 0 : index
    %c0_26 = arith.constant 0 : index
    %25 = vector.load %arg6[%c0_23, %c1_24, %c0_25, %c0_26] : memref<1x4x8x16xf32, #tpu.memory_space<vmem>>, vector<1x1x8x16xf32>
    %26 = vector.shape_cast %25 : vector<1x1x8x16xf32> to vector<8x16xf32>
    %27 = vector.shape_cast %24 : vector<8x16xf32> to vector<1x1x8x16xf32>
    tpu.vector_store %arg6[%c0_23, %c1_24, %c0_25, %c0_26], %27 {strides = array<i32>} : memref<1x4x8x16xf32, #tpu.memory_space<vmem>>, vector<1x1x8x16xf32>,
    %28 = vector.extract_strided_slice %3 {offsets = [0, 32], sizes = [8, 16], strides = [1, 1]} : vector<8x192xf32> to vector<8x16xf32>
    %c0_27 = arith.constant 0 : index
    %c2 = arith.constant 2 : index
    %c0_28 = arith.constant 0 : index
    %c0_29 = arith.constant 0 : index
    %29 = vector.load %arg4[%c0_27, %c2, %c0_28, %c0_29] : memref<1x4x8x16xf32, #tpu.memory_space<vmem>>, vector<1x1x8x16xf32>
    %30 = vector.shape_cast %29 : vector<1x1x8x16xf32> to vector<8x16xf32>
    %31 = vector.shape_cast %28 : vector<8x16xf32> to vector<1x1x8x16xf32>
    tpu.vector_store %arg4[%c0_27, %c2, %c0_28, %c0_29], %31 {strides = array<i32>} : memref<1x4x8x16xf32, #tpu.memory_space<vmem>>, vector<1x1x8x16xf32>,
    %32 = vector.extract_strided_slice %3 {offsets = [0, 96], sizes = [8, 16], strides = [1, 1]} : vector<8x192xf32> to vector<8x16xf32>
    %c0_30 = arith.constant 0 : index
    %c2_31 = arith.constant 2 : index
    %c0_32 = arith.constant 0 : index
    %c0_33 = arith.constant 0 : index
    %33 = vector.load %arg5[%c0_30, %c2_31, %c0_32, %c0_33] : memref<1x4x8x16xf32, #tpu.memory_space<vmem>>, vector<1x1x8x16xf32>
    %34 = vector.shape_cast %33 : vector<1x1x8x16xf32> to vector<8x16xf32>
    %35 = vector.shape_cast %32 : vector<8x16xf32> to vector<1x1x8x16xf32>
    tpu.vector_store %arg5[%c0_30, %c2_31, %c0_32, %c0_33], %35 {strides = array<i32>} : memref<1x4x8x16xf32, #tpu.memory_space<vmem>>, vector<1x1x8x16xf32>,
    %36 = vector.extract_strided_slice %3 {offsets = [0, 160], sizes = [8, 16], strides = [1, 1]} : vector<8x192xf32> to vector<8x16xf32>
    %c0_34 = arith.constant 0 : index
    %c2_35 = arith.constant 2 : index
    %c0_36 = arith.constant 0 : index
    %c0_37 = arith.constant 0 : index
    %37 = vector.load %arg6[%c0_34, %c2_35, %c0_36, %c0_37] : memref<1x4x8x16xf32, #tpu.memory_space<vmem>>, vector<1x1x8x16xf32>
    %38 = vector.shape_cast %37 : vector<1x1x8x16xf32> to vector<8x16xf32>
    %39 = vector.shape_cast %36 : vector<8x16xf32> to vector<1x1x8x16xf32>
    tpu.vector_store %arg6[%c0_34, %c2_35, %c0_36, %c0_37], %39 {strides = array<i32>} : memref<1x4x8x16xf32, #tpu.memory_space<vmem>>, vector<1x1x8x16xf32>,
    %40 = vector.extract_strided_slice %3 {offsets = [0, 48], sizes = [8, 16], strides = [1, 1]} : vector<8x192xf32> to vector<8x16xf32>
    %c0_38 = arith.constant 0 : index
    %c3 = arith.constant 3 : index
    %c0_39 = arith.constant 0 : index
    %c0_40 = arith.constant 0 : index
    %41 = vector.load %arg4[%c0_38, %c3, %c0_39, %c0_40] : memref<1x4x8x16xf32, #tpu.memory_space<vmem>>, vector<1x1x8x16xf32>
    %42 = vector.shape_cast %41 : vector<1x1x8x16xf32> to vector<8x16xf32>
    %43 = vector.shape_cast %40 : vector<8x16xf32> to vector<1x1x8x16xf32>
    tpu.vector_store %arg4[%c0_38, %c3, %c0_39, %c0_40], %43 {strides = array<i32>} : memref<1x4x8x16xf32, #tpu.memory_space<vmem>>, vector<1x1x8x16xf32>,
    %44 = vector.extract_strided_slice %3 {offsets = [0, 112], sizes = [8, 16], strides = [1, 1]} : vector<8x192xf32> to vector<8x16xf32>
    %c0_41 = arith.constant 0 : index
    %c3_42 = arith.constant 3 : index
    %c0_43 = arith.constant 0 : index
    %c0_44 = arith.constant 0 : index
    %45 = vector.load %arg5[%c0_41, %c3_42, %c0_43, %c0_44] : memref<1x4x8x16xf32, #tpu.memory_space<vmem>>, vector<1x1x8x16xf32>
    %46 = vector.shape_cast %45 : vector<1x1x8x16xf32> to vector<8x16xf32>
    %47 = vector.shape_cast %44 : vector<8x16xf32> to vector<1x1x8x16xf32>
    tpu.vector_store %arg5[%c0_41, %c3_42, %c0_43, %c0_44], %47 {strides = array<i32>} : memref<1x4x8x16xf32, #tpu.memory_space<vmem>>, vector<1x1x8x16xf32>,
    %48 = vector.extract_strided_slice %3 {offsets = [0, 176], sizes = [8, 16], strides = [1, 1]} : vector<8x192xf32> to vector<8x16xf32>
    %c0_45 = arith.constant 0 : index
    %c3_46 = arith.constant 3 : index
    %c0_47 = arith.constant 0 : index
    %c0_48 = arith.constant 0 : index
    %49 = vector.load %arg6[%c0_45, %c3_46, %c0_47, %c0_48] : memref<1x4x8x16xf32, #tpu.memory_space<vmem>>, vector<1x1x8x16xf32>
    %50 = vector.shape_cast %49 : vector<1x1x8x16xf32> to vector<8x16xf32>
    %51 = vector.shape_cast %48 : vector<8x16xf32> to vector<1x1x8x16xf32>
    tpu.vector_store %arg6[%c0_45, %c3_46, %c0_47, %c0_48], %51 {strides = array<i32>} : memref<1x4x8x16xf32, #tpu.memory_space<vmem>>, vector<1x1x8x16xf32>,
    return
  }
  func.func @transform_0(%arg0: i32, %arg1: i32) -> (i32, i32, i32) {
    %c0_i32 = arith.constant 0 : i32
    %c0_i32_0 = arith.constant 0 : i32
    return %arg0, %arg1, %c0_i32 : i32, i32, i32
  }
  func.func @transform_1(%arg0: i32, %arg1: i32) -> (i32, i32) {
    %c0_i32 = arith.constant 0 : i32
    %c0_i32_0 = arith.constant 0 : i32
    %c0_i32_1 = arith.constant 0 : i32
    return %c0_i32, %c0_i32_0 : i32, i32
  }
  func.func @transform_2(%arg0: i32, %arg1: i32) -> (i32, i32, i32, i32) {
    %c0_i32 = arith.constant 0 : i32
    %c0_i32_0 = arith.constant 0 : i32
    %c0_i32_1 = arith.constant 0 : i32
    return %arg0, %c0_i32, %arg1, %c0_i32_0 : i32, i32, i32, i32
  }
  func.func @transform_3(%arg0: i32, %arg1: i32) -> (i32, i32, i32, i32) {
    %c0_i32 = arith.constant 0 : i32
    %c0_i32_0 = arith.constant 0 : i32
    %c0_i32_1 = arith.constant 0 : i32
    return %arg0, %c0_i32, %arg1, %c0_i32_0 : i32, i32, i32, i32
  }
  func.func @transform_4(%arg0: i32, %arg1: i32) -> (i32, i32, i32, i32) {
    %c0_i32 = arith.constant 0 : i32
    %c0_i32_0 = arith.constant 0 : i32
    %c0_i32_1 = arith.constant 0 : i32
    return %arg0, %c0_i32, %arg1, %c0_i32_0 : i32, i32, i32, i32
  }
}

</mosaic_0001>

<bundles_post_ra>
// kernel: tpu_custom_call.1
= control target key start
LH: loop header
LB: loop body
LE: loop exit
PB: predicated region body
PF: predicated region fallthrough
CT: control target
= control target key end

     0   :  { %s1203_s0 = inlined_call_operand.hbm [shape: f32[2,8,32], index: 0, kind: input, shape index: {}]   ;;  %s1204_s1 = inlined_call_operand.hbm [shape: f32[32,192], index: 1, kind: input, shape index: {}]   ;;  %s1205_s2 = inlined_call_operand.hbm [shape: f32[2,4,8,16], index: 2, kind: output, shape index: {0}]   ;;  %s1206_s3 = inlined_call_operand.hbm [shape: f32[2,4,8,16], index: 3, kind: output, shape index: {1}]   ;;  %s1207_s4 = inlined_call_operand.hbm [shape: f32[2,4,8,16], index: 4, kind: output, shape index: {2}]  }
   0x1   :  { %1211 = sst [smem:[#allocation15_spill]] %s1203_s0 }
   0x2   :  { %1212 = sst [smem:[#allocation16_spill]] %s1204_s1 }
   0x3   :  { %10 = vsyncpa [#allocation3], 0 }
   0x4   :  { %12 = vsyncpa [#allocation3 + $0x1], 0 }
   0x5   :  { %13 = vsyncpa [#allocation6], 0 }
   0x6   :  { %14 = vsyncpa [#allocation4], 0 }
   0x7   :  { %16 = vsyncpa [#allocation4 + $0x1], 0 }
   0x8   :  { %17 = vsyncpa [#allocation9], 0 }
   0x9   :  { %19 = vsyncpa [#allocation9 + $0x1], 0  ;;  %s979_s15 = smov 0   ;;  %s981_s16 = smov 0  }
   0xa   :  { %s983_s17 = smov 0   ;;  %s985_s18 = smov 0  }
   0xb   :  { %s987_s19 = smov 0   ;;  %s989_s20 = smov 0  }
   0xc LB: > { %s1010_s21 = sadd.s32 4294967295, %s940_s20   ;;  %p604_p0 = scmp.ge.s32.totalorder %s940_s20, 1  ;;  %s940_s20 = sphi %s989_s20, %s25_s20   ;;  %s936_s19 = sphi %s987_s19, %s1226_s19   ;;  %s932_s18 = sphi %s985_s18, %s1225_s18   ;;  %s928_s17 = sphi %s983_s17, %s1224_s17   ;;  %s924_s16 = sphi %s981_s16, %s1223_s16   ;;  %s920_s15 = sphi %s979_s15, %s1222_s15  }
   0xd   : > { %p60_p1 = scmp.eq.s32.totalorder %s1010_s21, 0  ;;  %p175_p2 = scmp.lt.s32.totalorder %s940_s20, 3 }
   0xe   : > { %s1213_s1 = sld [smem:[#allocation16_spill]]  ;;  %s942_s26 = smov [#allocation5]  }
   0xf   : > { %p1018_p3 = pnand %p604_p0, %p175_p2  ;;  %s188_s27 = sshll.u32 %s942_s26, 4  ;;  %s189_s27 = int_to_ptr.vmem [resolvable:$true] %s188_s27 }
  0x10   : > { %p606_p6 = scmp.ge.s32.totalorder %s940_s20, 2  ;;  %s943_s28 = smov 256  }
  0x11   : > { %p652_p4 = pneg %p1018_p3  ;;  %s944_s29 = smov 16  }
  0x12   : > { %s1208_s30 = sadd.s32 4294967294, %s940_s20   ;;  %s37_s5 = sadd.s32 1, %s936_s19 }
  0x13   : > { %p653_p5 = pnand %p652_p4, %p60_p1  ;;  %s46_s6 = sadd.s32 1, %s928_s17 }
  0x14   : > { %s186_s24 = sshll.u32 %s1213_s1, 4  ;;  %p39_p7 = scmp.ge.s32.totalorder %s37_s5, 2  ;;  %s187_s24 = int_to_ptr.hbm [resolvable:$true] %s186_s24 }
  0x15   : > { %655 = dma.hbm_to_vmem [thread:$0]  (!%p653_p5), %s187_s24, 1024, %s189_s27, [#allocation6], %s943_s28, %s943_s28, %s944_s29  }
  0x16   : > { %p53_p8 = scmp.ne.s32.totalorder %s928_s17, %s924_s16  ;;  %p54_p9 = scmp.eq.s32.totalorder %s940_s20, 0 }
  0x17   : > { %p59_p10 = scmp.ne.s32.totalorder %s924_s16, %s920_s15  ;;  %s1228_s5 = smov (%p39_p7, %s37_s5), 0 }
  0x18   : > { %p1037_p11 = por %p54_p9, %p53_p8  ;;  %s41_s9 = ssub.s32 %s936_s19, %s1228_s5 }
  0x19   : > { %p1043_p12 = por %p60_p1, %p59_p10  ;;  %p106_p13 = scmp.eq.s32.totalorder %s1010_s21, 1 }
  0x1a   : > { %p44_p0 = scmp.eq.s32.totalorder %s41_s9, 0  ;;  %p112_p2 = scmp.eq.s32.totalorder %s1208_s30, 1 }
  0x1b   : > { %p1052_p4 = por %p106_p13, %p53_p8  ;;  %p671_p5 = scmp.lt.s32.totalorder %s940_s20, 2 }
  0x1c   : > { %s1058_s11 = scalar_select %p44_p0, %s928_s17, %s46_s6  }
  0x1d   : > { %p1060_p7 = por %p112_p2, %p59_p10  ;;  %s202_s13 = sand.u32 1, %s928_s17  }
  0x1e   : > { %s607_s14 = sshll.u32 %s202_s13, 3  ;;  %s608_s22 = sshll.u32 %s936_s19, 3 }
  0x1f   : > { %s1219_s0 = sld [smem:[#allocation15_spill]]  ;;  %s206_s27 = scalar_lea.vmem [#allocation2], %s607_s14 }
  0x20   : > { %s215_s28 = sshll.u32 %s206_s27, 4  ;;  %p657_p8 = pnand %p671_p5, %p1037_p11  ;;  %s216_s28 = int_to_ptr.vmem [resolvable:$true] %s215_s28 }
  0x21   : > { %s203_s6 = scalar_lea.sflag [#allocation3], %s202_s13  ;;  %s1074_s9 = sand.u32 (!%p1018_p3), 1, %s924_s16  }
  0x22   : > { %s610_s23 = sshll.u32 (!%p1018_p3), %s1074_s9, 3 }
  0x23   : > { %224 = sbr.rel (%p1018_p3) target bundleno = 333 (0x14d), region = 28  ;;  %s230_s14 = scalar_lea.vmem (!%p1018_p3), [#allocation2], %s610_s23 }
  0x25   : > { %s211_s26 = scalar_lea.hbm %s1219_s0, %s608_s22  ;;  %s227_s22 = scalar_lea.sflag (!%p1018_p3), [#allocation3], %s1074_s9 }
  0x26   : > { %s213_s29 = sshll.u32 %s211_s26, 4  ;;  %s214_s29 = int_to_ptr.hbm [resolvable:$true] %s213_s29 }
  0x27   : > { %659 = dma.hbm_to_vmem [thread:$0]  (!%p657_p8), %s214_s29, 128, %s216_s28, %s203_s6  }
  0x28   : > { %903 = dma.done.wait (%p1043_p12), %s227_s22, 128  }
  0x29   : > { %905 = vsyncadd (%p1043_p12), %s227_s22, 4294967168 }
  0x2a   : > { %907 = dma.done.wait (%p60_p1), [#allocation6], 1024  }
  0x2b   : > { %909 = vsyncadd (%p60_p1), [#allocation6], 4294966272  ;;  %v278_v0 = vld [vmem:[#allocation5 + $0x30] sm:$0xff]  ;;  %v276_v1 = vld [vmem:[#allocation5 + $0x20] sm:$0xff]  ;;  %vm280_vm0 = vcmask 261120   ;;  %s1087_s25 = sshll.u32 %s1074_s9, 5 }
  0x2c   : > { %296 = vmatpush.msra.mxu0 %v278_v0  ;;  %v279_v2 = vld [vmem:[#allocation5 + $0x38] sm:$0xff]  ;;  %v274_v3 = vld [vmem:[#allocation5 + $0x10] sm:$0xff]  ;;  %v277_v4 = vld [vmem:[#allocation5 + $0x28] sm:$0xff]  ;;  %vm324_vm1 = vcmask 130048   ;;  %s945_s7 = smov 112   ;;  %s946_s8 = smov 32  }
  0x2d   : > { %316 = vmatpush.msra.mxu1 %v279_v2  ;;  %v275_v5 = vld [vmem:[#allocation5 + $0x18] sm:$0xff]  ;;  %v272_v6 = vld [vmem:[#allocation5] sm:$0xff]  ;;  %v273_v8 = vld [vmem:[#allocation5 + $0x8] sm:$0xff]  ;;  %s1090_s13 = scalar_lea.vmem [#allocation7], %s1087_s25  ;;  %s947_s24 = smov 64  }
  0x2e   : > { %297 = vmatpush.msra.mxu0 %v276_v1  ;;  %v271_v7 = vld [vmem:[%s230_s14] sm:$0xff]  ;;  %s1095_s26 = scalar_lea.vmem [#allocation10], %s1087_s25  ;;  %s948_s27 = smov 16  }
  0x2f   : > { %317 = vmatpush.msra.mxu1 %v277_v4  ;;  %s949_s28 = smov 48   ;;  %s950_s29 = smov 80  }
  0x30   : > { %298 = vmatpush.msra.mxu0 %v274_v3  ;;  %s951_s6 = smov 96   ;;  %s1106_s23 = sshll.u32 %s932_s18, 5 }
  0x31   : > { %318 = vmatpush.msra.mxu1 %v275_v5  ;;  %s263_s22 = scalar_lea.vmem [#allocation8], %s1087_s25  ;;  %s814_s30 = scalar_lea.hbm %s1206_s3, 64 }
  0x32   : > { %299 = vmatpush.msra.mxu0 %v272_v6 }
  0x33   : > { %615 = vmatmul.msk.f32.vlgmr.msra.gmra.mxu0 %vm280_vm0, %v271_v7  ;;  %319 = vmatpush.msra.mxu1 %v273_v8 }
  0x34   : > { %616 = vmatmul.msk.f32.vlgmr.msra.gmra.mxu1 %vm280_vm0, %v271_v7 }
  0xb0   : > { %v301_v9 = vpop.f32.mrf.mxu0 }
  0xb1   : > { %332 = vrot.lane.b32.xlu2 %v301_v9, %s945_s7  ;;  %353 = vrot.lane.b32.xlu1 %v301_v9, %s946_s8  ;;  %v321_v10 = vpop.f32.mrf.mxu1  ;;  %325 = vst.msk [vmem:[%s1090_s13] sm:$0xff] %vm324_vm1, %v301_v9  ;;  %s419_s8 = scalar_lea.hbm %s1206_s3, %s1106_s23 }
  0xb2   : > { %327 = vrot.lane.b32.xlu0 %v301_v9, %s947_s24  ;;  %331 = vst.msk [vmem:[%s1095_s26] sm:$0xff] %vm324_vm1, %v321_v10  ;;  %s420_s24 = sshll.u32 %s263_s22, 4  ;;  %s421_s24 = int_to_ptr.vmem [resolvable:$true] %s420_s24 }
  0xb9   : > { %343 = vrot.lane.b32.xlu2 %v321_v10, %s945_s7  ;;  %368 = vrot.lane.b32.xlu1 %v301_v9, %s948_s27  ;;  %s383_s27 = sand.u32 1, %s1010_s21  }
  0xba   : > { %337 = vrot.lane.b32.xlu0 %v301_v9, %s949_s28  ;;  %s422_s28 = sshll.u32 %s419_s8, 4  ;;  %s423_s28 = int_to_ptr.hbm [resolvable:$true] %s422_s28 }
  0xbb   : > { %s808_s14 = sshra.s32 %s423_s28, 4  ;;  %s809_s14 = int_to_ptr.hbm [resolvable:$true] %s808_s14 }
  0xbc   : > { %s810_s7 = scalar_lea.hbm %s809_s14, 32  ;;  %p815_p10 = scmp.lt.s32.totalorder %s809_s14, %s1206_s3 }
  0xbd   : > { %p811_p1 = scmp.ne.s32.totalorder %s809_s14, %s810_s7  ;;  %p816_p11 = scmp.lt.s32.totalorder %s814_s30, %s810_s7 }
  0xbf   : > { %p812_p3 = pnand %p811_p1, %p1052_p4  ;;  %p817_p12 = por %p816_p11, %p815_p10 }
  0xc1   : > { %363 = vrot.lane.b32.xlu2 %v301_v9, %s950_s29  ;;  %358 = vrot.lane.b32.xlu1 %v321_v10, %s951_s6  ;;  %p813_p9 = pneg %p812_p3 }
  0xc2   : > { %348 = vrot.lane.b32.xlu0 %v301_v9, %s951_s6  ;;  %s1122_s6 = scalar_lea.sflag [#allocation9], %s383_s27 }
  0xc3   : > { %p818_p13 = pnand %p817_p12, %p813_p9 }
  0xca   : > { %373 = vrot.lane.b32.xlu0 %v321_v10, %s950_s29  ;;  %s401_s29 = scalar_lea.hbm %s1205_s2, %s1106_s23 }
 0x10b   : > { %v333_v11 = vpop.permute.xlu2 %332 }
 0x10c   : > { %617 = vst.msk [vmem:[%s1090_s13 + $0x8] sm:$0xff] %vm324_vm1, %v333_v11 }
 0x113   : > { %v344_v12 = vpop.permute.xlu2 %343 }
 0x114   : > { %619 = vst.msk [vmem:[%s1095_s26 + $0x8] sm:$0xff] %vm324_vm1, %v344_v12 }
 0x11b   : > { %v364_v13 = vpop.permute.xlu2 %363 }
 0x11c   : > { %623 = vst.msk [vmem:[%s1090_s13 + $0x18] sm:$0xff] %vm324_vm1, %v364_v13 }
 0x123   : > { %v354_v14 = vpop.permute.xlu1 %353 }
 0x124   : > { %621 = vst.msk [vmem:[%s263_s22 + $0x10] sm:$0xff] %vm324_vm1, %v354_v14  ;;  %v328_v15 = vpop.permute.xlu0 %327 }
 0x125   : > { %330 = vst.msk [vmem:[%s263_s22] sm:$0xff] %vm324_vm1, %v328_v15 }
 0x12b   : > { %v369_v16 = vpop.permute.xlu1 %368 }
 0x12c   : > { %624 = vst.msk [vmem:[%s263_s22 + $0x18] sm:$0xff] %vm324_vm1, %v369_v16  ;;  %v338_v17 = vpop.permute.xlu0 %337 }
 0x12d   : > { %618 = vst.msk [vmem:[%s263_s22 + $0x8] sm:$0xff] %vm324_vm1, %v338_v17 }
 0x12e   : > { %821 = shalt.err (!%p818_p13)
}
 0x12f   : > { %s1209_s22 = smov 128   ;;  %s953_s27 = smov 8  }
 0x130   : > { %647 = dma.vmem_to_hbm [thread:$0]  (%p1052_p4), %s421_s24, 512, %s423_s28, %s1122_s6, %s1209_s22, %s1209_s22, %s953_s27  }
 0x131   : > { %s402_s0 = sshll.u32 %s1090_s13, 4  ;;  %s404_s1 = sshll.u32 %s401_s29, 4  ;;  %s403_s0 = int_to_ptr.vmem [resolvable:$true] %s402_s0  ;;  %s405_s1 = int_to_ptr.hbm [resolvable:$true] %s404_s1 }
 0x132   : > { %s437_s25 = scalar_lea.hbm %s1207_s4, %s1106_s23  ;;  %s379_s14 = scalar_lea.sflag [#allocation4], %s1074_s9 }
 0x133   : > { %v359_v18 = vpop.permute.xlu1 %358  ;;  %s836_s7 = sshra.s32 %s405_s1, 4  ;;  %s842_s29 = scalar_lea.hbm %s1205_s2, 64  ;;  %s837_s7 = int_to_ptr.hbm [resolvable:$true] %s836_s7 }
 0x134   : > { %v349_v19 = vpop.permute.xlu0 %348  ;;  %622 = vst.msk [vmem:[%s1095_s26 + $0x10] sm:$0xff] %vm324_vm1, %v359_v18  ;;  %s838_s21 = scalar_lea.hbm %s837_s7, 32  ;;  %p843_p8 = scmp.lt.s32.totalorder %s837_s7, %s1205_s2 }
 0x135   : > { %620 = vst.msk [vmem:[%s1090_s13 + $0x10] sm:$0xff] %vm324_vm1, %v349_v19  ;;  %p839_p0 = scmp.ne.s32.totalorder %s837_s7, %s838_s21  ;;  %p844_p1 = scmp.lt.s32.totalorder %s842_s29, %s838_s21 }
 0x137   : > { %p840_p2 = pnand %p839_p0, %p1052_p4  ;;  %p845_p3 = por %p844_p1, %p843_p8 }
 0x139   : > { %p841_p5 = pneg %p840_p2 }
 0x13b   : > { %p846_p9 = pnand %p845_p3, %p841_p5 }
 0x13d   : > { %849 = shalt.err (!%p846_p9)
}
 0x13e   : > { %s1220_s9 = smov 128   ;;  %s438_s13 = sshll.u32 %s1095_s26, 4  ;;  %v374_v20 = vpop.permute.xlu0 %373  ;;  %s439_s13 = int_to_ptr.vmem [resolvable:$true] %s438_s13 }
 0x13f   : > { %646 = dma.vmem_to_hbm [thread:$0]  (%p1052_p4), %s403_s0, 512, %s405_s1, %s379_s14, %s1220_s9, %s1220_s9, %s953_s27  }
 0x140   : > { %s440_s23 = sshll.u32 %s437_s25, 4  ;;  %625 = vst.msk [vmem:[%s1095_s26 + $0x18] sm:$0xff] %vm324_vm1, %v374_v20  ;;  %s870_s21 = scalar_lea.hbm %s1207_s4, 64  ;;  %s441_s23 = int_to_ptr.hbm [resolvable:$true] %s440_s23 }
 0x141   : > { %s864_s22 = sshra.s32 %s441_s23, 4  ;;  %s865_s22 = int_to_ptr.hbm [resolvable:$true] %s864_s22 }
 0x142   : > { %s866_s30 = scalar_lea.hbm %s865_s22, 32  ;;  %p871_p13 = scmp.lt.s32.totalorder %s865_s22, %s1207_s4 }
 0x143   : > { %p867_p10 = scmp.ne.s32.totalorder %s865_s22, %s866_s30  ;;  %p872_p0 = scmp.lt.s32.totalorder %s870_s21, %s866_s30 }
 0x145   : > { %p868_p11 = pnand %p867_p10, %p1052_p4  ;;  %p873_p2 = por %p872_p0, %p871_p13 }
 0x147   : > { %p869_p12 = pneg %p868_p11 }
 0x149   : > { %p874_p5 = pnand %p873_p2, %p869_p12 }
 0x14b   : > { %877 = shalt.err (!%p874_p5)
}
 0x14c   : > { %648 = dma.vmem_to_hbm [thread:$0]  (%p1052_p4), %s439_s13, 512, %s441_s23, %s1122_s6, %s1220_s9, %s1220_s9, %s953_s27  }
 0x14d PF: > { %s455_s26 = sand.u32 1, %s920_s15   ;;  %p661_p8 = pnand %p606_p6, %p1060_p7 }
 0x14e   : > { %s456_s1 = scalar_lea.sflag [#allocation4], %s455_s26 }
 0x14f   : > { %p662_p1 = pneg %p661_p8 }
 0x151   : > { %911 = dma.done.wait (%p662_p1), %s456_s1, 512  }
 0x152   : > { %913 = vsyncadd (%p662_p1), %s456_s1, 4294966784  ;;  %s1221_s25 = sadd.s32 4294967294, %s940_s20  }
 0x153   : > { %s465_s10 = sand.u32 1, %s1221_s25  }
 0x154   : > { %s466_s14 = scalar_lea.sflag [#allocation9], %s465_s10 }
 0x155   : > { %915 = dma.done.wait (%p662_p1), %s466_s14, 1024  }
 0x156   : > { %917 = vsyncadd (%p662_p1), %s466_s14, 4294966272  ;;  %s25_s20 = sadd.s32 1, %s940_s20   ;;  %s1222_s15 = smov %s924_s16 }
 0x157   : > { %p22_p4 = scmp.ge.s32.totalorder %s25_s20, 4   ;;  %s1223_s16 = smov %s928_s17 }
 0x158   : > { %s1224_s17 = smov %s1058_s11  ;;  %s1225_s18 = smov %s936_s19 }
 0x159   : > { %s1226_s19 = smov %s1228_s5  ;;  %24 = sbr.rel (!%p22_p4) target bundleno = 12 (0xc), region = 118 }
 0x15e   :  { %482 = vsyncpa [#allocation3], 1 }
 0x15f   :  { %484 = vsyncpa [#allocation3 + $0x1], 1 }
 0x160   :  { %485 = vsyncpa [#allocation6], 1 }
 0x161   :  { %486 = vsyncpa [#allocation4], 1 }
 0x162   :  { %488 = vsyncpa [#allocation4 + $0x1], 1 }
 0x163   :  { %489 = vsyncpa [#allocation9], 1 }
 0x164   :  { %491 = vsyncpa [#allocation9 + $0x1], 1 }

</bundles_post_ra>
